<compile_context>
chip_gen: v7x
topology: tpu7x:2x2x1
jax: 0.10.0
libtpu: 0.0.40
codegen_flags: <defaults>
</compile_context>

<pallas_src>
import jax
import jax.numpy as jnp
from jax import lax
from jax.experimental import pallas as pl
from jax.experimental.pallas import tpu as pltpu

NEG = -1e30     # fill for padded label lanes (finite: avoids 0*inf -> NaN)
LANE = 128


def _round_up(x, m):
    return (x + m - 1) // m * m


# ---------------------------------------------------------------------------
# Kernel 1: the Linears FFN  —  logits = relu(x @ W1 + b1) @ W2 + b2
#   x tile:  [TN, D]  bf16      W1: [D, H] bf16 (resident)    b1: [1, H]  f32
#   out tile:[TN, Cp] f32       W2: [H, Cp] bf16 (resident)   b2: [1, Cp] f32
#   (W2/b2 are padded to Cp=128 label lanes; padded b2 lanes hold NEG.)
# ---------------------------------------------------------------------------
def ffn_kernel(x_ref, w1_ref, b1_ref, w2_ref, b2_ref, out_ref):
    h = jnp.dot(x_ref[...], w1_ref[...], preferred_element_type=jnp.float32)   # [TN, H] f32
    h = jnp.maximum(h + b1_ref[...], 0.0)        # f32 epilogue; [1,H] broadcasts on sublanes
    h = h.astype(jnp.bfloat16)                   # bf16 back into the MXU
    o = jnp.dot(h, w2_ref[...], preferred_element_type=jnp.float32)            # [TN, Cp] f32
    out_ref[...] = (o + b2_ref[...]).astype(out_ref.dtype)


# ---------------------------------------------------------------------------
# Kernel 2: CRF negative log-likelihood (stanza-style CRFLoss, batch_average=True)
#   mask convention: 1 == padding, 0 == real token (stanza word_mask)
#   logits are [B, T, Cp] with padded label lanes == NEG; trans is [Cp, Cp] zero-padded.
#   Assumes position 0 is never padding (same assumption as the reference module).
# ---------------------------------------------------------------------------
def crf_loss_kernel(logits_ref, mask_ref, tags_ref, trans_ref, loss_ref):
    B, T, Cp = logits_ref.shape
    logits = logits_ref[...]                 # [B, T, Cp] f32
    pad = mask_ref[...]                      # [B, T] int32 (1 = pad)
    tags = tags_ref[...]                     # [B, T] int32 (gold labels < real C)
    trans = trans_ref[...]                   # [Cp, Cp] f32
    valid = (pad == 0)                       # [B, T]

    # one-hot of gold tags (only real label lanes are ever selected)
    class_ids = lax.broadcasted_iota(jnp.int32, (B, T, Cp), 2)
    onehot = (class_ids == tags[:, :, None]).astype(jnp.float32)   # [B, T, Cp]

    # ----- unary score: sum_t logits[b, t, tag[b, t]] over valid tokens -----
    unary_tok = jnp.sum(logits * onehot, axis=-1)                  # [B, T]
    unary = jnp.sum(jnp.where(valid, unary_tok, 0.0), axis=1, keepdims=True)   # [B, 1]

    # ----- binary score: sum_t trans[tag_t, tag_{t+1}] over valid next tokens -----
    oh_prev = onehot[:, : T - 1, :].reshape(B * (T - 1), Cp)
    row = jnp.dot(oh_prev, trans,
                  preferred_element_type=jnp.float32).reshape(B, T - 1, Cp)
    binary_tok = jnp.sum(row * onehot[:, 1:, :], axis=-1)          # [B, T-1]
    binary = jnp.sum(jnp.where(valid[:, 1:], binary_tok, 0.0),
                     axis=1, keepdims=True)                        # [B, 1]

    # ----- log partition via forward recursion (fori_loop over time) -----
    valid_f = valid.astype(jnp.float32)                            # hoisted
    tpos = lax.broadcasted_iota(jnp.int32, (B, T), 1)              # hoisted

    def step(t, alphas):
        logit_t = logits_ref[:, pl.ds(t, 1), :][:, 0, :]           # [B, Cp]
        # valid[:, t] via lane-select (avoids a dynamic slice on the lane axis)
        v_t = jnp.sum(valid_f * (tpos == t).astype(jnp.float32),
                      axis=1, keepdims=True) > 0.5                 # [B, 1]
        scores = alphas[:, :, None] + trans[None, :, :]            # [B, Cp_prev, Cp_cur]
        m = jnp.max(scores, axis=1)                                # [B, Cp]
        lse = jnp.log(jnp.sum(jnp.exp(scores - m[:, None, :]), axis=1)) + m
        new_a = logit_t + lse
        return jnp.where(v_t, new_a, alphas)                       # carry alphas on pads

    alphas = lax.fori_loop(1, T, step, logits[:, 0, :], unroll=2)  # [B, Cp]
    mfin = jnp.max(alphas, axis=-1, keepdims=True)                 # [B, 1]
    log_norm = jnp.log(jnp.sum(jnp.exp(alphas - mfin), axis=-1,
                               keepdims=True)) + mfin              # [B, 1]

    # ----- loss = sum(-(unary + binary - log_norm)) / batch_size -----
    ll = unary + binary - log_norm
    loss_ref[0, 0] = -jnp.sum(ll) / float(B)


# ---------------------------------------------------------------------------
# Wrapper
# ---------------------------------------------------------------------------
def ner_classifier_forward(word_reprs, word_mask, entity_label_idxs, params):
    """Returns (crf_loss, logits) exactly like NERClassifier.forward (loss) + logits."""
    B, T, D = word_reprs.shape
    w1, b1, w2, b2, trans = (params["w1"], params["b1"], params["w2"],
                             params["b2"], params["trans"])
    H = w1.shape[1]
    C = w2.shape[1]
    N = B * T
    Cp = _round_up(max(C, LANE), LANE)           # lane-dense label dim

    # Token tiling: large tiles for pipelining; multiple of 16 sublanes (bf16 packing).
    TN = 256 if N >= 256 else _round_up(N, 16)
    Np = _round_up(N, TN)

    x = word_reprs.reshape(N, D)
    if Np != N:
        x = jnp.pad(x, ((0, Np - N), (0, 0)))
    x = x.astype(jnp.bfloat16)

    w1b = w1.astype(jnp.bfloat16)
    w2p = jnp.zeros((H, Cp), jnp.float32).at[:, :C].set(w2).astype(jnp.bfloat16)
    b1r = b1.reshape(1, H).astype(jnp.float32)
    b2p = jnp.full((1, Cp), NEG, jnp.float32).at[0, :C].set(b2.astype(jnp.float32))

    # VMEM budget: resident weights (double-buffered by the pipeline), double-buffered
    # activation I/O tiles, and the f32 hidden intermediate; 2x headroom, clamped.
    ffn_vmem = 2 * (2 * ((D * H + H * Cp) * 2 + (H + Cp) * 4)
                    + 2 * (TN * D * 2 + TN * Cp * 4)
                    + 2 * TN * H * 4)
    ffn_vmem = int(min(max(ffn_vmem, 16 * 1024 * 1024), 48 * 1024 * 1024))

    logits_p = pl.pallas_call(
        ffn_kernel,
        out_shape=jax.ShapeDtypeStruct((Np, Cp), jnp.float32),
        grid_spec=pltpu.PrefetchScalarGridSpec(
            num_scalar_prefetch=0,
            grid=(Np // TN,),
            in_specs=[
                pl.BlockSpec((TN, D), lambda i: (i, 0)),    # x tile (pipelined)
                pl.BlockSpec((D, H), lambda i: (0, 0)),     # W1 (resident)
                pl.BlockSpec((1, H), lambda i: (0, 0)),     # b1 (resident)
                pl.BlockSpec((H, Cp), lambda i: (0, 0)),    # W2 padded (resident)
                pl.BlockSpec((1, Cp), lambda i: (0, 0)),    # b2 padded (resident)
            ],
            out_specs=pl.BlockSpec((TN, Cp), lambda i: (i, 0)),
        ),
        compiler_params=pltpu.CompilerParams(
            dimension_semantics=("parallel",),              # shard across 2 TCs on v7x
            vmem_limit_bytes=ffn_vmem,
        ),
    )(x, w1b, b1r, w2p, b2p)

    logits_padded = logits_p[:N].reshape(B, T, Cp)          # padded label lanes == NEG
    logits = logits_padded[:, :, :C]                        # real logits (module's FFN output)

    trans_p = jnp.zeros((Cp, Cp), jnp.float32).at[:C, :C].set(trans.astype(jnp.float32))

    crf_vmem = 2 * (4 * B * T * Cp * 4 + 4 * B * Cp * Cp * 4 + 2 * Cp * Cp * 4)
    crf_vmem = int(min(max(crf_vmem, 16 * 1024 * 1024), 48 * 1024 * 1024))

    loss = pl.pallas_call(
        crf_loss_kernel,
        out_shape=jax.ShapeDtypeStruct((1, 1), jnp.float32),
        in_specs=[pl.BlockSpec(memory_space=pltpu.MemorySpace.VMEM)] * 4,
        out_specs=pl.BlockSpec(memory_space=pltpu.MemorySpace.SMEM),
        compiler_params=pltpu.CompilerParams(vmem_limit_bytes=crf_vmem),
    )(logits_padded, word_mask.astype(jnp.int32),
      entity_label_idxs.astype(jnp.int32), trans_p)

    return loss[0, 0], logits


# ---------------------------------------------------------------------------
# Pure-JAX reference (same math, same bf16 matmul precision) for a correctness check
# ---------------------------------------------------------------------------
def reference_forward(word_reprs, word_mask, entity_label_idxs, params):
    w1, b1, w2, b2, trans = (params["w1"], params["b1"], params["w2"],
                             params["b2"], params["trans"])
    B, T, D = word_reprs.shape
    C = w2.shape[1]

    xb = word_reprs.reshape(B * T, D).astype(jnp.bfloat16)
    h = jnp.dot(xb, w1.astype(jnp.bfloat16), preferred_element_type=jnp.float32)
    h = jnp.maximum(h + b1, 0.0)
    logits = jnp.dot(h.astype(jnp.bfloat16), w2.astype(jnp.bfloat16),
                     preferred_element_type=jnp.float32) + b2
    logits = logits.reshape(B, T, C)

    valid = (word_mask == 0)
    tags = entity_label_idxs
    onehot = jax.nn.one_hot(tags, C, dtype=jnp.float32)
    unary = jnp.sum(jnp.where(valid, jnp.sum(logits * onehot, -1), 0.0), -1)
    b_tok = trans[tags[:, :-1], tags[:, 1:]]
    binary = jnp.sum(jnp.where(valid[:, 1:], b_tok, 0.0), -1)

    alphas = logits[:, 0, :]
    for t in range(1, T):
        new_a = logits[:, t, :] + jax.nn.logsumexp(
            alphas[:, :, None] + trans[None, :, :], axis=1)
        alphas = jnp.where(valid[:, t:t + 1], new_a, alphas)
    log_norm = jax.nn.logsumexp(alphas, axis=-1)
    loss = -jnp.sum(unary + binary - log_norm) / B
    return loss, logits


if __name__ == "__main__":
    # Small synthetic shapes standing in for xlmr_dim=768, hidden_num, num_labels.
    B, T, D, H, C = 2, 8, 32, 64, 8

    key = jax.random.PRNGKey(0)
    k_x, k_w1, k_b1, k_w2, k_b2, k_tr, k_tag = jax.random.split(key, 7)

    word_reprs = jax.random.normal(k_x, (B, T, D), dtype=jnp.float32)
    # word_mask: 1 = padding (stanza convention); batch 0 full length, batch 1 length 5
    lengths = jnp.array([T, 5], dtype=jnp.int32)
    word_mask = (jnp.arange(T)[None, :] >= lengths[:, None]).astype(jnp.int32)
    entity_label_idxs = jax.random.randint(k_tag, (B, T), 0, C, dtype=jnp.int32)

    params = {
        "w1": 0.05 * jax.random.normal(k_w1, (D, H), dtype=jnp.float32),
        "b1": 0.05 * jax.random.normal(k_b1, (H,), dtype=jnp.float32),
        "w2": 0.05 * jax.random.normal(k_w2, (H, C), dtype=jnp.float32),
        "b2": 0.05 * jax.random.normal(k_b2, (C,), dtype=jnp.float32),
        # CRF transitions parameter (nn.Parameter(torch.zeros(C, C)) in the module;
        # random here so the binary-score path is exercised).
        "trans": 0.1 * jax.random.normal(k_tr, (C, C), dtype=jnp.float32),
    }

    loss, logits = ner_classifier_forward(word_reprs, word_mask,
                                          entity_label_idxs, params)
    jax.block_until_ready(loss)

    ref_loss, ref_logits = reference_forward(word_reprs, word_mask,
                                             entity_label_idxs, params)
    assert jnp.allclose(logits, ref_logits, rtol=1e-4, atol=1e-4), "logits mismatch"
    assert jnp.allclose(loss, ref_loss, rtol=1e-4, atol=1e-4), "loss mismatch"
    assert bool(jnp.isfinite(loss)), "non-finite loss"

    print("KERNEL_OK")
</pallas_src>

<mosaic_0001>
module attributes {stable_mosaic.version = 11 : i64} {
  func.func @ffn_kernel(%arg0: i32, %arg1: memref<16x32xbf16, #tpu.memory_space<vmem>>, %arg2: memref<32x64xbf16, #tpu.memory_space<vmem>>, %arg3: memref<1x64xf32, #tpu.memory_space<vmem>>, %arg4: memref<64x128xbf16, #tpu.memory_space<vmem>>, %arg5: memref<1x128xf32, #tpu.memory_space<vmem>>, %arg6: memref<16x128xf32, #tpu.memory_space<vmem>>) attributes {dimension_semantics = [#tpu.dimension_semantics<parallel>], iteration_bounds = array<i64: 1>, scalar_prefetch = 0 : i64, scratch_operands = 0 : i64, tpu.core_type = #tpu.core_type<tc>, window_params = [{transform_indices = @transform_0, window_bounds = array<i64: 16, 32>}, {pipeline_mode = #tpu.pipeline_mode<synchronous>, transform_indices = @transform_1, window_bounds = array<i64: 32, 64>}, {pipeline_mode = #tpu.pipeline_mode<synchronous>, transform_indices = @transform_2, window_bounds = array<i64: 1, 64>}, {pipeline_mode = #tpu.pipeline_mode<synchronous>, transform_indices = @transform_3, window_bounds = array<i64: 64, 128>}, {pipeline_mode = #tpu.pipeline_mode<synchronous>, transform_indices = @transform_4, window_bounds = array<i64: 1, 128>}, {transform_indices = @transform_5, window_bounds = array<i64: 16, 128>}]} {
    %c0 = arith.constant 0 : index
    %c0_0 = arith.constant 0 : index
    %0 = vector.load %arg1[%c0, %c0_0] : memref<16x32xbf16, #tpu.memory_space<vmem>>, vector<16x32xbf16>
    %c0_1 = arith.constant 0 : index
    %c0_2 = arith.constant 0 : index
    %1 = vector.load %arg2[%c0_1, %c0_2] : memref<32x64xbf16, #tpu.memory_space<vmem>>, vector<32x64xbf16>
    %cst = arith.constant dense<0.000000e+00> : vector<16x64xf32>
    %2 = tpu.matmul %0, %1, %cst {dimension_numbers = #tpu.dot_dimension_numbers<[1], [0], [0], [1], [0, 0, 1, 1], [], []>} : vector<16x32xbf16>, vector<32x64xbf16>, vector<16x64xf32> -> vector<16x64xf32>
    %c0_3 = arith.constant 0 : index
    %c0_4 = arith.constant 0 : index
    %3 = vector.load %arg3[%c0_3, %c0_4] : memref<1x64xf32, #tpu.memory_space<vmem>>, vector<1x64xf32>
    %4 = vector.broadcast %3 : vector<1x64xf32> to vector<16x64xf32>
    %5 = arith.addf %2, %4 : vector<16x64xf32>
    %cst_5 = arith.constant 0.000000e+00 : f32
    %6 = vector.broadcast %cst_5 : f32 to vector<16x64xf32>
    %7 = arith.maximumf %5, %6 : vector<16x64xf32>
    %8 = arith.truncf %7 : vector<16x64xf32> to vector<16x64xbf16>
    %c0_6 = arith.constant 0 : index
    %c0_7 = arith.constant 0 : index
    %9 = vector.load %arg4[%c0_6, %c0_7] : memref<64x128xbf16, #tpu.memory_space<vmem>>, vector<64x128xbf16>
    %cst_8 = arith.constant dense<0.000000e+00> : vector<16x128xf32>
    %10 = tpu.matmul %8, %9, %cst_8 {dimension_numbers = #tpu.dot_dimension_numbers<[1], [0], [0], [1], [0, 0, 1, 1], [], []>} : vector<16x64xbf16>, vector<64x128xbf16>, vector<16x128xf32> -> vector<16x128xf32>
    %c0_9 = arith.constant 0 : index
    %c0_10 = arith.constant 0 : index
    %11 = vector.load %arg5[%c0_9, %c0_10] : memref<1x128xf32, #tpu.memory_space<vmem>>, vector<1x128xf32>
    %12 = vector.broadcast %11 : vector<1x128xf32> to vector<16x128xf32>
    %13 = arith.addf %10, %12 : vector<16x128xf32>
    %c0_11 = arith.constant 0 : index
    %c0_12 = arith.constant 0 : index
    %14 = vector.load %arg6[%c0_11, %c0_12] : memref<16x128xf32, #tpu.memory_space<vmem>>, vector<16x128xf32>
    tpu.vector_store %arg6[%c0_11, %c0_12], %13 {strides = array<i32>} : memref<16x128xf32, #tpu.memory_space<vmem>>, vector<16x128xf32>,
    return
  }
  func.func @transform_0(%arg0: i32) -> (i32, i32) {
    %c0_i32 = arith.constant 0 : i32
    %c0_i32_0 = arith.constant 0 : i32
    return %arg0, %c0_i32 : i32, i32
  }
  func.func @transform_1(%arg0: i32) -> (i32, i32) {
    %c0_i32 = arith.constant 0 : i32
    %c0_i32_0 = arith.constant 0 : i32
    %c0_i32_1 = arith.constant 0 : i32
    return %c0_i32, %c0_i32_0 : i32, i32
  }
  func.func @transform_2(%arg0: i32) -> (i32, i32) {
    %c0_i32 = arith.constant 0 : i32
    %c0_i32_0 = arith.constant 0 : i32
    %c0_i32_1 = arith.constant 0 : i32
    return %c0_i32, %c0_i32_0 : i32, i32
  }
  func.func @transform_3(%arg0: i32) -> (i32, i32) {
    %c0_i32 = arith.constant 0 : i32
    %c0_i32_0 = arith.constant 0 : i32
    %c0_i32_1 = arith.constant 0 : i32
    return %c0_i32, %c0_i32_0 : i32, i32
  }
  func.func @transform_4(%arg0: i32) -> (i32, i32) {
    %c0_i32 = arith.constant 0 : i32
    %c0_i32_0 = arith.constant 0 : i32
    %c0_i32_1 = arith.constant 0 : i32
    return %c0_i32, %c0_i32_0 : i32, i32
  }
  func.func @transform_5(%arg0: i32) -> (i32, i32) {
    %c0_i32 = arith.constant 0 : i32
    %c0_i32_0 = arith.constant 0 : i32
    return %arg0, %c0_i32 : i32, i32
  }
}

</mosaic_0001>

<bundles_post_ra>
// kernel: tpu_custom_call.1
= control target key start
LH: loop header
LB: loop body
LE: loop exit
PB: predicated region body
PF: predicated region fallthrough
CT: control target
= control target key end

     0   :  { %10 = vsyncpa [#allocation3], 0  ;;  %s505_s0 = inlined_call_operand.hbm [shape: bf16[16,32], index: 0, kind: input, shape index: {}]   ;;  %s506_s1 = inlined_call_operand.hbm [shape: bf16[32,64], index: 1, kind: input, shape index: {}]   ;;  %s507_s2 = inlined_call_operand.vmem [shape: f32[1,64], index: 2, kind: input, shape index: {}]   ;;  %s508_s3 = inlined_call_operand.hbm [shape: bf16[64,128], index: 3, kind: input, shape index: {}]   ;;  %s509_s4 = inlined_call_operand.vmem [shape: f32[1,128], index: 4, kind: input, shape index: {}]   ;;  %s510_s5 = inlined_call_operand.hbm [shape: f32[16,128], index: 5, kind: output, shape index: {}]  }
   0x1   :  { %11 = vsyncpa [#allocation6], 0 }
   0x2   :  { %12 = vsyncpa [#allocation4], 0  ;;  %s395_s18 = smov [#allocation5]   ;;  %s396_s20 = smov [#allocation2]  }
   0x3   :  { %s30_s19 = sshll.u32 %s395_s18, 4  ;;  %s18_s21 = sshll.u32 %s396_s20, 4  ;;  %s31_s19 = int_to_ptr.vmem [resolvable:$true] %s30_s19  ;;  %s435_s21 = int_to_ptr.vmem [resolvable:$true] %s18_s21 }
   0x4   :  { %s301_s24 = scalar_lea.hbm %s506_s1, 256 }
   0x5   :  { %p302_p0 = scmp.ne.s32.totalorder %s506_s1, %s301_s24  ;;  %p305_p1 = scmp.lt.u32.totalorder %s301_s24, %s506_s1 }
   0x7   :  { %p307_p2 = pnand %p305_p1, %p302_p0 }
   0x9   :  { %310 = shalt.err (!%p307_p2)
}
   0xa   :  { %s311_s29 = scalar_lea.vmem %s31_s19, 256  ;;  %p316_p4 = scmp.lt.s32.totalorder %s31_s19, %s31_s19 }
   0xb   :  { %p312_p3 = scmp.ne.s32.totalorder %s31_s19, %s311_s29  ;;  %p317_p5 = scmp.lt.s32.totalorder %s311_s29, %s311_s29 }
   0xd   :  { %p318_p6 = por %p317_p5, %p316_p4 }
   0xf   :  { %p319_p7 = pnand %p318_p6, %p312_p3 }
  0x11   :  { %322 = shalt.err (!%p319_p7)
}
  0x12   :  { %s397_s30 = smov 64   ;;  %s398_s6 = smov 4  }
  0x13   :  { %36 = dma.hbm_to_vmem [thread:$0]  %s506_s1, 256, %s31_s19, [#allocation6], %s397_s30, %s397_s30, %s398_s6  }
  0x14   :  { %s323_s11 = scalar_lea.hbm %s505_s0, 128 }
  0x15   :  { %p324_p8 = scmp.ne.s32.totalorder %s505_s0, %s323_s11  ;;  %p327_p9 = scmp.lt.u32.totalorder %s323_s11, %s505_s0 }
  0x17   :  { %p329_p10 = pnand %p327_p9, %p324_p8 }
  0x19   :  { %332 = shalt.err (!%p329_p10)
}
  0x1a   :  { %s333_s16 = scalar_lea.vmem %s435_s21, 128  ;;  %p338_p12 = scmp.lt.s32.totalorder %s435_s21, %s435_s21 }
  0x1b   :  { %p334_p11 = scmp.ne.s32.totalorder %s435_s21, %s333_s16  ;;  %p339_p13 = scmp.lt.s32.totalorder %s333_s16, %s333_s16 }
  0x1d   :  { %p340_p0 = por %p339_p13, %p338_p12 }
  0x1f   :  { %p341_p1 = pnand %p340_p0, %p334_p11 }
  0x21   :  { %344 = shalt.err (!%p341_p1)
}
  0x22   :  { %24 = dma.hbm_to_vmem [thread:$0]  %s505_s0, 128, %s435_s21, [#allocation3], %s397_s30, %s397_s30, %s398_s6  }
  0x23   :  { %s399_s18 = smov [#allocation7]   ;;  %s345_s23 = scalar_lea.hbm %s508_s3, 512 }
  0x24   :  { %s44_s19 = sshll.u32 %s399_s18, 4  ;;  %p346_p2 = scmp.ne.s32.totalorder %s508_s3, %s345_s23  ;;  %s45_s19 = int_to_ptr.vmem [resolvable:$true] %s44_s19 }
  0x25   :  { %p349_p3 = scmp.lt.u32.totalorder %s345_s23, %s508_s3 }
  0x27   :  { %p351_p4 = pnand %p349_p3, %p346_p2 }
  0x29   :  { %354 = shalt.err (!%p351_p4)
}
  0x2a   :  { %s355_s28 = scalar_lea.vmem %s45_s19, 512  ;;  %p360_p6 = scmp.lt.s32.totalorder %s45_s19, %s45_s19 }
  0x2b   :  { %p356_p5 = scmp.ne.s32.totalorder %s45_s19, %s355_s28  ;;  %p361_p7 = scmp.lt.s32.totalorder %s355_s28, %s355_s28 }
  0x2d   :  { %p362_p8 = por %p361_p7, %p360_p6 }
  0x2f   :  { %p363_p9 = pnand %p362_p8, %p356_p5 }
  0x31   :  { %366 = shalt.err (!%p363_p9)
}
  0x32   :  { %50 = dma.hbm_to_vmem [thread:$0]  %s508_s3, 512, %s45_s19, [#allocation6], %s397_s30, %s397_s30, %s398_s6  }
  0x33   :  { %389 = dma.done.wait [#allocation3], 128  }
  0x34   :  { %390 = vsyncadd [#allocation3], 4294967168 }
  0x35   :  { %391 = dma.done.wait [#allocation6], 768  }
  0x36   :  { %392 = vsyncadd [#allocation6], 4294966528  ;;  %v400_v0 = vmov 0.0   ;;  %vm401_vm0 = vmmov 0   ;;  %v294_v1 = vld [vmem:[#allocation5] sm:$0xff]   ;;  %v295_v2 = vld [vmem:[#allocation5 + $0x8] sm:$0xff]  }
  0x37   :  { %264 = vmatprep.subr.bf16.mxu0 %v400_v0  ;;  %268 = vmatprep.mubr.msk.bf16.mxu0 %vm401_vm0, %v400_v0  ;;  %v297_v3 = vld [vmem:[#allocation7] sm:$0xff]   ;;  %v296_v4 = vld [vmem:[#allocation2] sm:$0xff]   ;;  %vm93_vm1 = vcmask 261120   ;;  %v299_v6 = vld [vmem:[#allocation7 + $0x10] sm:$0xff]   ;;  %vm180_vm2 = vcmask 523264   ;;  %s402_s7 = smov [#allocation8]  }
  0x38   :  { %272 = vmatprep.subr.bf16.mxu1 %v400_v0  ;;  %280 = vmatprep.mubr.msk.bf16.mxu1 %vm401_vm0, %v400_v0  ;;  %v298_v5 = vld [vmem:[#allocation7 + $0x8] sm:$0xff]   ;;  %v300_v7 = vld [vmem:[#allocation7 + $0x18] sm:$0xff]   ;;  %s232_s8 = sshll.u32 %s402_s7, 4  ;;  %s233_s8 = int_to_ptr.vmem [resolvable:$true] %s232_s8 }
  0x39   :  { %265 = vmatpush3.bf16.msra.mxu0 %v294_v1  ;;  %273 = vmatpush3.bf16.msra.mxu1 %v297_v3  ;;  %v245_v8 = vld [vmem:[%s507_s2] ss:$0 sm:$0xff]  ;;  %s367_s2 = scalar_lea.vmem %s233_s8, 256  ;;  %p372_p11 = scmp.lt.s32.totalorder %s233_s8, %s233_s8 }
  0x3a   :  { %266 = vmatprep.subr.bf16.mxu0 %v400_v0  ;;  %274 = vmatprep.subr.bf16.mxu1 %v400_v0  ;;  %v250_v18 = vld [vmem:[%s509_s4] ss:$0 sm:$0xff]  ;;  %p368_p10 = scmp.ne.s32.totalorder %s233_s8, %s367_s2  ;;  %p373_p12 = scmp.lt.s32.totalorder %s367_s2, %s367_s2 }
  0x3c   :  { %p374_p13 = por %p373_p12, %p372_p11 }
  0x3d   :  { %267 = vmatpush3.bf16.msra.mxu0 %v295_v2  ;;  %275 = vmatpush3.bf16.msra.mxu1 %v298_v5 }
  0x3e   :  { %276 = vmatprep.subr.bf16.mxu1 %v400_v0  ;;  %p375_p0 = pnand %p374_p13, %p368_p10 }
  0x40   :  { %269 = vmatmul.mubr.msk.bf16.vlgmr.msra.gmra.mrb[0].mxu0 %vm93_vm1, %v296_v4 }
  0x41   :  { %277 = vmatpush3.bf16.msra.mxu1 %v299_v6 }
  0x42   :  { %278 = vmatprep.subr.bf16.mxu1 %v400_v0 }
  0x45   :  { %279 = vmatpush3.bf16.msra.mxu1 %v300_v7 }
 0x113   :  { %v131_v9 = vpop.f32.mrb[0].mxu0 }
 0x114   :  { %v132_v10 = vadd.f32 %v245_v8, %v131_v9  ;;  %v270_v11 = vpop.f32.mrb[1].mxu0 }
 0x115   :  { %v134_v12 = vpop.f32.mrb[2].mxu0 }
 0x116   :  { %v135_v13 = vadd.f32 %v245_v8, %v134_v12  ;;  %v271_v14 = vpop.f32.mrb[3].mxu0  ;;  %v138_v15 = vmax.f32 %v132_v10, 0.0 }
 0x118   :  { %v139_v16 = vmax.f32 %v135_v13, 0.0 }
 0x11a   :  { %v140_v17 = vpack.c.bf16 %v139_v16, %v138_v15 }
 0x11c   :  { %281 = vmatmul.mubr.msk.bf16.vlgmr.msra.gmra.mrb[0].mxu1 %vm180_vm2, %v140_v17 }
 0x1ef   :  { %v218_v19 = vpop.f32.mrb[0].mxu1 }
 0x1f0   :  { %v219_v20 = vadd.f32 %v250_v18, %v218_v19  ;;  %v282_v21 = vpop.f32.mrb[1].mxu1 }
 0x1f1   :  { %v221_v22 = vpop.f32.mrb[2].mxu1 }
 0x1f2   :  { %225 = vst [vmem:[#allocation8] sm:$0xff] %v219_v20  ;;  %v222_v23 = vadd.f32 %v250_v18, %v221_v22  ;;  %v283_v24 = vpop.f32.mrb[3].mxu1 }
 0x1f4   :  { %226 = vst [vmem:[#allocation8 + $0x8] sm:$0xff] %v222_v23 }
 0x1f5   :  { %378 = shalt.err (!%p375_p0)
}
 0x1f6   :  { %s379_s10 = scalar_lea.hbm %s510_s5, 256 }
 0x1f7   :  { %p380_p1 = scmp.ne.s32.totalorder %s510_s5, %s379_s10  ;;  %p383_p2 = scmp.lt.u32.totalorder %s379_s10, %s510_s5 }
 0x1f9   :  { %p385_p3 = pnand %p383_p2, %p380_p1 }
 0x1fb   :  { %388 = shalt.err (!%p385_p3)
}
 0x1fc   :  { %s403_s15 = smov 128   ;;  %s404_s16 = smov 8  }
 0x1fd   :  { %238 = dma.vmem_to_hbm [thread:$0]  %s233_s8, 256, %s510_s5, [#allocation4], %s403_s15, %s403_s15, %s404_s16  }
 0x1fe   :  { %393 = dma.done.wait [#allocation4], 256  }
 0x1ff   :  { %394 = vsyncadd [#allocation4], 4294967040 }
 0x200   :  { %242 = vsyncpa [#allocation3], 1 }
 0x201   :  { %243 = vsyncpa [#allocation6], 1 }
 0x202   :  { %244 = vsyncpa [#allocation4], 1 }

</bundles_post_ra>
